<compile_context>
chip_gen: v6e
topology: v6e:2x2x1
jax: 0.10.0
libtpu: 0.0.40
codegen_flags: <defaults>
</compile_context>

<pallas_src>
import numpy as np
import jax
import jax.numpy as jnp
from jax import lax
from jax.experimental import pallas as pl
from jax.experimental.pallas import tpu as pltpu

EPS = 1e-5  # PyTorch BatchNorm1d default eps


# --------------------------------------------------------------------------
# Build-time folding: Conv1d + eval BatchNorm1d  ->  one dense (padded) matmul.
# --------------------------------------------------------------------------
def conv_bn_to_matmul(w, b, gamma, beta, mean, var, Lin, pad, rows_pad, cols_pad):
    w = np.asarray(jax.device_get(w), np.float32)
    b = np.asarray(jax.device_get(b), np.float32)
    gamma = np.asarray(jax.device_get(gamma), np.float32)
    beta = np.asarray(jax.device_get(beta), np.float32)
    mean = np.asarray(jax.device_get(mean), np.float32)
    var = np.asarray(jax.device_get(var), np.float32)

    Cout, Cin, K = w.shape
    Lout = Lin + 2 * pad - K + 1
    assert Cin * Lin <= rows_pad and Cout * Lout <= cols_pad

    M = np.zeros((rows_pad, cols_pad), np.float32)
    for co in range(Cout):
        for ci in range(Cin):
            for k in range(K):
                for lo in range(Lout):
                    li = lo + k - pad
                    if 0 <= li < Lin:
                        M[ci * Lin + li, co * Lout + lo] = w[co, ci, k]

    # BatchNorm fold: y = (conv(x)+b)*s + t,  s = gamma/sqrt(var+eps)
    s = gamma / np.sqrt(var + EPS)
    t = beta - mean * s
    s_vec = np.zeros((cols_pad,), np.float32)
    bias_vec = np.zeros((cols_pad,), np.float32)
    t_vec = np.zeros((cols_pad,), np.float32)
    s_vec[: Cout * Lout] = np.repeat(s, Lout)          # co-major, lo-minor
    bias_vec[: Cout * Lout] = np.repeat(b, Lout)
    t_vec[: Cout * Lout] = np.repeat(t, Lout)

    M_folded = M * s_vec[None, :]
    b_folded = bias_vec * s_vec + t_vec
    return (jnp.asarray(M_folded, dtype=jnp.bfloat16),
            jnp.asarray(b_folded[None, :], dtype=jnp.float32))


def linear_to_matmul(W, b, rows_pad, cols_pad, scale):
    """nn.Linear(in,out) -> padded (rows_pad, cols_pad) matmul, scale folded in."""
    W = np.asarray(jax.device_get(W), np.float32)      # (out, in)
    b = np.asarray(jax.device_get(b), np.float32)      # (out,)
    out_f, in_f = W.shape
    M = np.zeros((rows_pad, cols_pad), np.float32)
    M[:in_f, :out_f] = W.T * scale
    bias = np.zeros((cols_pad,), np.float32)
    bias[:out_f] = b * scale
    return (jnp.asarray(M, dtype=jnp.bfloat16),
            jnp.asarray(bias[None, :], dtype=jnp.float32))


# --------------------------------------------------------------------------
# Pallas kernel: whole forward pass for one batch tile.
# --------------------------------------------------------------------------
def net_kernel(x_ref,
               m1_ref, b1_ref,
               m2_ref, b2_ref,
               m3_ref, b3_ref,
               m4_ref, b4_ref,
               wl_ref, bl_ref,
               o_ref):
    f32 = jnp.float32
    bf16 = jnp.bfloat16

    def dot(h_bf16, m_ref):
        # bf16 x bf16 -> f32 accumulate, single MXU pass.
        return jnp.dot(h_bf16, m_ref[...],
                       precision=lax.Precision.DEFAULT,
                       preferred_element_type=f32)

    def sig(z_f32):
        # sigmoid(z) = 0.5*tanh(0.5*z) + 0.5  ->  one EUP op + cheap VPU
        # mul/add (vs exp + reciprocal = two EUP pushes).  Math in bf16: 2x
        # EUP/VPU rate on v6e/v7x, half the vreg/spill traffic everywhere,
        # and the result is already bf16 for the next MXU pass.
        zb = z_f32.astype(bf16)
        return jnp.tanh(zb * 0.5) * 0.5 + 0.5

    h = x_ref[...].astype(bf16)                         # (TB, 12)
    h = sig(dot(h, m1_ref) + b1_ref[...])               # (TB, 128) bf16
    h = sig(dot(h, m2_ref) + b2_ref[...])               # (TB, 256) bf16
    h = sig(dot(h, m3_ref) + b3_ref[...])               # (TB, 256) bf16
    h = sig(dot(h, m4_ref) + b4_ref[...])               # (TB, 128) bf16
    # Dropout is identity in eval mode; output scale already folded into wl/bl.
    o_ref[...] = dot(h, wl_ref) + bl_ref[...]           # (TB, 8) f32, col 0 real


def _round8(n):
    return ((n + 7) // 8) * 8


def _choose_tb(B, block_b):
    """Batch tile: multiple of 8 sublanes; >= 2 grid steps whenever B >= 16
    so the 'parallel' grid axis can feed both v7x TensorCores; capped at
    block_b (default 512) to amortize per-step overhead at large batch."""
    if B <= 8:
        return 8
    tb = min(block_b, -(-B // 2))      # cdiv(B, 2) -> at least 2 grid steps
    return max(8, _round8(tb))


def net_forward(x, mats, biases, wl, bl, *, block_b=512):
    B, F = x.shape                      # F == 12 (module views input as (B,2,6))
    DN = wl.shape[1]                    # narrow padded output width (8)
    TB = _choose_tb(B, block_b)
    grid = (pl.cdiv(B, TB),)

    # Input consumed directly (no wrapper-side zero-pad copy): block (TB, F).
    in_specs = [pl.BlockSpec((TB, F), lambda i: (i, 0))]
    args = [x]
    # Weights/biases: grid-invariant full-array blocks (fetched once; default
    # pipeline mode accepted per review).
    for M, bvec in list(zip(mats, biases)) + [(wl, bl)]:
        in_specs.append(pl.BlockSpec(M.shape, lambda i: (0, 0)))
        in_specs.append(pl.BlockSpec(bvec.shape, lambda i: (0, 0)))
        args += [M, bvec]

    out = pl.pallas_call(
        net_kernel,
        out_shape=jax.ShapeDtypeStruct((B, DN), jnp.float32),
        grid=grid,
        in_specs=in_specs,
        out_specs=pl.BlockSpec((TB, DN), lambda i: (i, 0)),
        compiler_params=pltpu.CompilerParams(
            dimension_semantics=("parallel",)),
    )(*args)
    return out[:, :1]                   # real result is column 0


# --------------------------------------------------------------------------
# Pure-JAX f32 reference (validates conv->matmul + BN folding + padding).
# --------------------------------------------------------------------------
def ref_forward(x, conv_params, wl, bl):
    B = x.shape[0]
    h = x.reshape(B, 2, 6)
    for (w, b, gamma, beta, mean, var, pad) in conv_params:
        y = lax.conv_general_dilated(
            h, w, window_strides=(1,), padding=[(pad, pad)],
            dimension_numbers=("NCH", "OIH", "NCH"))
        y = y + b[None, :, None]
        s = gamma / jnp.sqrt(var + EPS)
        t = beta - mean * s
        y = y * s[None, :, None] + t[None, :, None]
        h = 1.0 / (1.0 + jnp.exp(-y))
    h = h.reshape(B, -1)                      # (B, 128), final L = 1
    y = h @ wl.T + bl
    return y / 6.02214076 * 10.0


if __name__ == "__main__":
    key = jax.random.PRNGKey(0)

    # (Cin, Cout, K, pad, Lin, rows_pad, cols_pad);  L: 6 -> 6 -> 5 -> 3 -> 1
    layer_cfg = [
        (2,   8, 3, 1, 6,  12, 128),   # real 12 -> 48  (layer-1 rows NOT padded)
        (8,  32, 2, 0, 6, 128, 256),   # real 48 -> 160
        (32, 64, 3, 0, 5, 256, 256),   # real 160 -> 192
        (64, 128, 3, 0, 3, 256, 128),  # real 192 -> 128
    ]

    conv_params = []
    mats, biases = [], []
    for (cin, cout, k, pad, lin, rp, cp) in layer_cfg:
        key, kw, kb, kg, kbe, km, kv = jax.random.split(key, 7)
        w = jax.random.normal(kw, (cout, cin, k), jnp.float32) * 0.3
        b = jax.random.normal(kb, (cout,), jnp.float32) * 0.1
        gamma = jax.random.uniform(kg, (cout,), jnp.float32, 0.75, 1.25)
        beta = jax.random.normal(kbe, (cout,), jnp.float32) * 0.1
        mean = jax.random.normal(km, (cout,), jnp.float32) * 0.1
        var = jax.random.uniform(kv, (cout,), jnp.float32, 0.5, 1.5)
        conv_params.append((w, b, gamma, beta, mean, var, pad))
        M, bvec = conv_bn_to_matmul(w, b, gamma, beta, mean, var, lin, pad, rp, cp)
        mats.append(M)
        biases.append(bvec)

    key, kwl, kbl, kx = jax.random.split(key, 4)
    W_lin = jax.random.normal(kwl, (1, 128), jnp.float32) * 0.1   # nn.Linear(128, 1)
    b_lin = jax.random.normal(kbl, (1,), jnp.float32) * 0.1

    OUT_SCALE = 10.0 / 6.02214076
    # Narrow (8-lane) padded output: 16x less HBM writeback than 128 lanes.
    wl_k, bl_k = linear_to_matmul(W_lin, b_lin, rows_pad=128, cols_pad=8,
                                  scale=OUT_SCALE)

    # Input: module views input as (B, 2, 6) -> feed (B, 12).
    B = 8
    x = jax.random.normal(kx, (B, 12), jnp.float32)

    out = net_forward(x, mats, biases, wl_k, bl_k)
    out = jax.block_until_ready(out)

    ref = ref_forward(x, conv_params, W_lin, b_lin)
    # bf16 folded weights + bf16 tanh activations -> relaxed tolerance vs f32.
    np.testing.assert_allclose(np.asarray(out), np.asarray(ref),
                               rtol=5e-2, atol=5e-2)

    print("KERNEL_OK")
</pallas_src>

<mosaic_0001>
module attributes {stable_mosaic.version = 11 : i64} {
  func.func @net_kernel(%arg0: i32, %arg1: memref<8x12xf32, #tpu.memory_space<vmem>>, %arg2: memref<12x128xbf16, #tpu.memory_space<vmem>>, %arg3: memref<1x128xf32, #tpu.memory_space<vmem>>, %arg4: memref<128x256xbf16, #tpu.memory_space<vmem>>, %arg5: memref<1x256xf32, #tpu.memory_space<vmem>>, %arg6: memref<256x256xbf16, #tpu.memory_space<vmem>>, %arg7: memref<1x256xf32, #tpu.memory_space<vmem>>, %arg8: memref<256x128xbf16, #tpu.memory_space<vmem>>, %arg9: memref<1x128xf32, #tpu.memory_space<vmem>>, %arg10: memref<128x8xbf16, #tpu.memory_space<vmem>>, %arg11: memref<1x8xf32, #tpu.memory_space<vmem>>, %arg12: memref<8x8xf32, #tpu.memory_space<vmem>>) attributes {dimension_semantics = [#tpu.dimension_semantics<parallel>], iteration_bounds = array<i64: 1>, scalar_prefetch = 0 : i64, scratch_operands = 0 : i64, tpu.core_type = #tpu.core_type<tc>, window_params = [{transform_indices = @transform_0, window_bounds = array<i64: 8, 12>}, {pipeline_mode = #tpu.pipeline_mode<synchronous>, transform_indices = @transform_1, window_bounds = array<i64: 12, 128>}, {pipeline_mode = #tpu.pipeline_mode<synchronous>, transform_indices = @transform_2, window_bounds = array<i64: 1, 128>}, {pipeline_mode = #tpu.pipeline_mode<synchronous>, transform_indices = @transform_3, window_bounds = array<i64: 128, 256>}, {pipeline_mode = #tpu.pipeline_mode<synchronous>, transform_indices = @transform_4, window_bounds = array<i64: 1, 256>}, {pipeline_mode = #tpu.pipeline_mode<synchronous>, transform_indices = @transform_5, window_bounds = array<i64: 256, 256>}, {pipeline_mode = #tpu.pipeline_mode<synchronous>, transform_indices = @transform_6, window_bounds = array<i64: 1, 256>}, {pipeline_mode = #tpu.pipeline_mode<synchronous>, transform_indices = @transform_7, window_bounds = array<i64: 256, 128>}, {pipeline_mode = #tpu.pipeline_mode<synchronous>, transform_indices = @transform_8, window_bounds = array<i64: 1, 128>}, {pipeline_mode = #tpu.pipeline_mode<synchronous>, transform_indices = @transform_9, window_bounds = array<i64: 128, 8>}, {pipeline_mode = #tpu.pipeline_mode<synchronous>, transform_indices = @transform_10, window_bounds = array<i64: 1, 8>}, {transform_indices = @transform_11, window_bounds = array<i64: 8, 8>}]} {
    %c0 = arith.constant 0 : index
    %c0_0 = arith.constant 0 : index
    %0 = vector.load %arg1[%c0, %c0_0] : memref<8x12xf32, #tpu.memory_space<vmem>>, vector<8x12xf32>
    %1 = arith.truncf %0 : vector<8x12xf32> to vector<8x12xbf16>
    %c0_1 = arith.constant 0 : index
    %c0_2 = arith.constant 0 : index
    %2 = vector.load %arg2[%c0_1, %c0_2] : memref<12x128xbf16, #tpu.memory_space<vmem>>, vector<12x128xbf16>
    %cst = arith.constant dense<0.000000e+00> : vector<8x128xf32>
    %3 = tpu.matmul %1, %2, %cst {dimension_numbers = #tpu.dot_dimension_numbers<[1], [0], [0], [1], [0, 0, 1, 1], [], []>} : vector<8x12xbf16>, vector<12x128xbf16>, vector<8x128xf32> -> vector<8x128xf32>
    %c0_3 = arith.constant 0 : index
    %c0_4 = arith.constant 0 : index
    %4 = vector.load %arg3[%c0_3, %c0_4] : memref<1x128xf32, #tpu.memory_space<vmem>>, vector<1x128xf32>
    %5 = vector.broadcast %4 : vector<1x128xf32> to vector<8x128xf32>
    %6 = arith.addf %3, %5 : vector<8x128xf32>
    %7 = arith.truncf %6 : vector<8x128xf32> to vector<8x128xbf16>
    %cst_5 = arith.constant 5.000000e-01 : bf16
    %8 = vector.broadcast %cst_5 : bf16 to vector<8x128xbf16>
    %9 = arith.mulf %7, %8 : vector<8x128xbf16>
    %10 = math.tanh %9 : vector<8x128xbf16>
    %cst_6 = arith.constant 5.000000e-01 : bf16
    %11 = vector.broadcast %cst_6 : bf16 to vector<8x128xbf16>
    %12 = arith.mulf %10, %11 : vector<8x128xbf16>
    %cst_7 = arith.constant 5.000000e-01 : bf16
    %13 = vector.broadcast %cst_7 : bf16 to vector<8x128xbf16>
    %14 = arith.addf %12, %13 : vector<8x128xbf16>
    %c0_8 = arith.constant 0 : index
    %c0_9 = arith.constant 0 : index
    %15 = vector.load %arg4[%c0_8, %c0_9] : memref<128x256xbf16, #tpu.memory_space<vmem>>, vector<128x256xbf16>
    %cst_10 = arith.constant dense<0.000000e+00> : vector<8x256xf32>
    %16 = tpu.matmul %14, %15, %cst_10 {dimension_numbers = #tpu.dot_dimension_numbers<[1], [0], [0], [1], [0, 0, 1, 1], [], []>} : vector<8x128xbf16>, vector<128x256xbf16>, vector<8x256xf32> -> vector<8x256xf32>
    %c0_11 = arith.constant 0 : index
    %c0_12 = arith.constant 0 : index
    %17 = vector.load %arg5[%c0_11, %c0_12] : memref<1x256xf32, #tpu.memory_space<vmem>>, vector<1x256xf32>
    %18 = vector.broadcast %17 : vector<1x256xf32> to vector<8x256xf32>
    %19 = arith.addf %16, %18 : vector<8x256xf32>
    %20 = arith.truncf %19 : vector<8x256xf32> to vector<8x256xbf16>
    %cst_13 = arith.constant 5.000000e-01 : bf16
    %21 = vector.broadcast %cst_13 : bf16 to vector<8x256xbf16>
    %22 = arith.mulf %20, %21 : vector<8x256xbf16>
    %23 = math.tanh %22 : vector<8x256xbf16>
    %cst_14 = arith.constant 5.000000e-01 : bf16
    %24 = vector.broadcast %cst_14 : bf16 to vector<8x256xbf16>
    %25 = arith.mulf %23, %24 : vector<8x256xbf16>
    %cst_15 = arith.constant 5.000000e-01 : bf16
    %26 = vector.broadcast %cst_15 : bf16 to vector<8x256xbf16>
    %27 = arith.addf %25, %26 : vector<8x256xbf16>
    %c0_16 = arith.constant 0 : index
    %c0_17 = arith.constant 0 : index
    %28 = vector.load %arg6[%c0_16, %c0_17] : memref<256x256xbf16, #tpu.memory_space<vmem>>, vector<256x256xbf16>
    %cst_18 = arith.constant dense<0.000000e+00> : vector<8x256xf32>
    %29 = tpu.matmul %27, %28, %cst_18 {dimension_numbers = #tpu.dot_dimension_numbers<[1], [0], [0], [1], [0, 0, 1, 1], [], []>} : vector<8x256xbf16>, vector<256x256xbf16>, vector<8x256xf32> -> vector<8x256xf32>
    %c0_19 = arith.constant 0 : index
    %c0_20 = arith.constant 0 : index
    %30 = vector.load %arg7[%c0_19, %c0_20] : memref<1x256xf32, #tpu.memory_space<vmem>>, vector<1x256xf32>
    %31 = vector.broadcast %30 : vector<1x256xf32> to vector<8x256xf32>
    %32 = arith.addf %29, %31 : vector<8x256xf32>
    %33 = arith.truncf %32 : vector<8x256xf32> to vector<8x256xbf16>
    %cst_21 = arith.constant 5.000000e-01 : bf16
    %34 = vector.broadcast %cst_21 : bf16 to vector<8x256xbf16>
    %35 = arith.mulf %33, %34 : vector<8x256xbf16>
    %36 = math.tanh %35 : vector<8x256xbf16>
    %cst_22 = arith.constant 5.000000e-01 : bf16
    %37 = vector.broadcast %cst_22 : bf16 to vector<8x256xbf16>
    %38 = arith.mulf %36, %37 : vector<8x256xbf16>
    %cst_23 = arith.constant 5.000000e-01 : bf16
    %39 = vector.broadcast %cst_23 : bf16 to vector<8x256xbf16>
    %40 = arith.addf %38, %39 : vector<8x256xbf16>
    %c0_24 = arith.constant 0 : index
    %c0_25 = arith.constant 0 : index
    %41 = vector.load %arg8[%c0_24, %c0_25] : memref<256x128xbf16, #tpu.memory_space<vmem>>, vector<256x128xbf16>
    %cst_26 = arith.constant dense<0.000000e+00> : vector<8x128xf32>
    %42 = tpu.matmul %40, %41, %cst_26 {dimension_numbers = #tpu.dot_dimension_numbers<[1], [0], [0], [1], [0, 0, 1, 1], [], []>} : vector<8x256xbf16>, vector<256x128xbf16>, vector<8x128xf32> -> vector<8x128xf32>
    %c0_27 = arith.constant 0 : index
    %c0_28 = arith.constant 0 : index
    %43 = vector.load %arg9[%c0_27, %c0_28] : memref<1x128xf32, #tpu.memory_space<vmem>>, vector<1x128xf32>
    %44 = vector.broadcast %43 : vector<1x128xf32> to vector<8x128xf32>
    %45 = arith.addf %42, %44 : vector<8x128xf32>
    %46 = arith.truncf %45 : vector<8x128xf32> to vector<8x128xbf16>
    %cst_29 = arith.constant 5.000000e-01 : bf16
    %47 = vector.broadcast %cst_29 : bf16 to vector<8x128xbf16>
    %48 = arith.mulf %46, %47 : vector<8x128xbf16>
    %49 = math.tanh %48 : vector<8x128xbf16>
    %cst_30 = arith.constant 5.000000e-01 : bf16
    %50 = vector.broadcast %cst_30 : bf16 to vector<8x128xbf16>
    %51 = arith.mulf %49, %50 : vector<8x128xbf16>
    %cst_31 = arith.constant 5.000000e-01 : bf16
    %52 = vector.broadcast %cst_31 : bf16 to vector<8x128xbf16>
    %53 = arith.addf %51, %52 : vector<8x128xbf16>
    %c0_32 = arith.constant 0 : index
    %c0_33 = arith.constant 0 : index
    %54 = vector.load %arg10[%c0_32, %c0_33] : memref<128x8xbf16, #tpu.memory_space<vmem>>, vector<128x8xbf16>
    %cst_34 = arith.constant dense<0.000000e+00> : vector<8x8xf32>
    %55 = tpu.matmul %53, %54, %cst_34 {dimension_numbers = #tpu.dot_dimension_numbers<[1], [0], [0], [1], [0, 0, 1, 1], [], []>} : vector<8x128xbf16>, vector<128x8xbf16>, vector<8x8xf32> -> vector<8x8xf32>
    %c0_35 = arith.constant 0 : index
    %c0_36 = arith.constant 0 : index
    %56 = vector.load %arg11[%c0_35, %c0_36] : memref<1x8xf32, #tpu.memory_space<vmem>>, vector<1x8xf32>
    %57 = vector.broadcast %56 : vector<1x8xf32> to vector<8x8xf32>
    %58 = arith.addf %55, %57 : vector<8x8xf32>
    %c0_37 = arith.constant 0 : index
    %c0_38 = arith.constant 0 : index
    %59 = vector.load %arg12[%c0_37, %c0_38] : memref<8x8xf32, #tpu.memory_space<vmem>>, vector<8x8xf32>
    tpu.vector_store %arg12[%c0_37, %c0_38], %58 {strides = array<i32>} : memref<8x8xf32, #tpu.memory_space<vmem>>, vector<8x8xf32>,
    return
  }
  func.func @transform_0(%arg0: i32) -> (i32, i32) {
    %c0_i32 = arith.constant 0 : i32
    %c0_i32_0 = arith.constant 0 : i32
    return %arg0, %c0_i32 : i32, i32
  }
  func.func @transform_1(%arg0: i32) -> (i32, i32) {
    %c0_i32 = arith.constant 0 : i32
    %c0_i32_0 = arith.constant 0 : i32
    %c0_i32_1 = arith.constant 0 : i32
    return %c0_i32, %c0_i32_0 : i32, i32
  }
  func.func @transform_2(%arg0: i32) -> (i32, i32) {
    %c0_i32 = arith.constant 0 : i32
    %c0_i32_0 = arith.constant 0 : i32
    %c0_i32_1 = arith.constant 0 : i32
    return %c0_i32, %c0_i32_0 : i32, i32
  }
  func.func @transform_3(%arg0: i32) -> (i32, i32) {
    %c0_i32 = arith.constant 0 : i32
    %c0_i32_0 = arith.constant 0 : i32
    %c0_i32_1 = arith.constant 0 : i32
    return %c0_i32, %c0_i32_0 : i32, i32
  }
  func.func @transform_4(%arg0: i32) -> (i32, i32) {
    %c0_i32 = arith.constant 0 : i32
    %c0_i32_0 = arith.constant 0 : i32
    %c0_i32_1 = arith.constant 0 : i32
    return %c0_i32, %c0_i32_0 : i32, i32
  }
  func.func @transform_5(%arg0: i32) -> (i32, i32) {
    %c0_i32 = arith.constant 0 : i32
    %c0_i32_0 = arith.constant 0 : i32
    %c0_i32_1 = arith.constant 0 : i32
    return %c0_i32, %c0_i32_0 : i32, i32
  }
  func.func @transform_6(%arg0: i32) -> (i32, i32) {
    %c0_i32 = arith.constant 0 : i32
    %c0_i32_0 = arith.constant 0 : i32
    %c0_i32_1 = arith.constant 0 : i32
    return %c0_i32, %c0_i32_0 : i32, i32
  }
  func.func @transform_7(%arg0: i32) -> (i32, i32) {
    %c0_i32 = arith.constant 0 : i32
    %c0_i32_0 = arith.constant 0 : i32
    %c0_i32_1 = arith.constant 0 : i32
    return %c0_i32, %c0_i32_0 : i32, i32
  }
  func.func @transform_8(%arg0: i32) -> (i32, i32) {
    %c0_i32 = arith.constant 0 : i32
    %c0_i32_0 = arith.constant 0 : i32
    %c0_i32_1 = arith.constant 0 : i32
    return %c0_i32, %c0_i32_0 : i32, i32
  }
  func.func @transform_9(%arg0: i32) -> (i32, i32) {
    %c0_i32 = arith.constant 0 : i32
    %c0_i32_0 = arith.constant 0 : i32
    %c0_i32_1 = arith.constant 0 : i32
    return %c0_i32, %c0_i32_0 : i32, i32
  }
  func.func @transform_10(%arg0: i32) -> (i32, i32) {
    %c0_i32 = arith.constant 0 : i32
    %c0_i32_0 = arith.constant 0 : i32
    %c0_i32_1 = arith.constant 0 : i32
    return %c0_i32, %c0_i32_0 : i32, i32
  }
  func.func @transform_11(%arg0: i32) -> (i32, i32) {
    %c0_i32 = arith.constant 0 : i32
    %c0_i32_0 = arith.constant 0 : i32
    return %arg0, %c0_i32 : i32, i32
  }
}

</mosaic_0001>

<bundles_post_ra>
// kernel: tpu_custom_call.1
= control target key start
LH: loop header
LB: loop body
LE: loop exit
PB: predicated region body
PF: predicated region fallthrough
CT: control target
= control target key end

     0   :  { %16 = vsyncpa [#allocation3], 0  ;;  %s1357_s0 = inlined_call_operand.vmem [shape: f32[8,12], index: 0, kind: input, shape index: {}]   ;;  %s1358_s1 = inlined_call_operand.vmem [shape: bf16[12,128], index: 1, kind: input, shape index: {}]   ;;  %s1359_s2 = inlined_call_operand.vmem [shape: f32[1,128], index: 2, kind: input, shape index: {}]   ;;  %s1360_s3 = inlined_call_operand.hbm [shape: bf16[128,256], index: 3, kind: input, shape index: {}]   ;;  %s1361_s4 = inlined_call_operand.vmem [shape: f32[1,256], index: 4, kind: input, shape index: {}]   ;;  %s1362_s5 = inlined_call_operand.hbm [shape: bf16[256,256], index: 5, kind: input, shape index: {}]   ;;  %s1363_s6 = inlined_call_operand.vmem [shape: f32[1,256], index: 6, kind: input, shape index: {}]   ;;  %s1364_s7 = inlined_call_operand.hbm [shape: bf16[256,128], index: 7, kind: input, shape index: {}]   ;;  %s1365_s8 = inlined_call_operand.vmem [shape: f32[1,128], index: 8, kind: input, shape index: {}]   ;;  %s1366_s9 = inlined_call_operand.vmem [shape: bf16[128,8], index: 9, kind: input, shape index: {}]   ;;  %s1367_s10 = inlined_call_operand.vmem [shape: f32[1,8], index: 10, kind: input, shape index: {}]   ;;  %s1368_s11 = inlined_call_operand.hbm [shape: f32[8,8], index: 11, kind: output, shape index: {}]  }
   0x1   :  { %17 = vsyncpa [#allocation6], 0 }
   0x2   :  { %18 = vsyncpa [#allocation4], 0  ;;  %s1216_s17 = smov [#allocation5]   ;;  %s1217_s19 = smov [#allocation2]  }
   0x3   :  { %s44_s18 = sshll.u32 %s1216_s17, 4  ;;  %s30_s20 = sshll.u32 %s1217_s19, 4  ;;  %s45_s18 = int_to_ptr.vmem [resolvable:$true] %s44_s18  ;;  %s31_s20 = int_to_ptr.vmem [resolvable:$true] %s30_s20 }
   0x4   :  { %s1138_s21 = scalar_lea.vmem %s45_s18, 4096  ;;  %p1143_p1 = scmp.lt.s32.totalorder %s45_s18, %s45_s18 }
   0x5   :  { %p1139_p0 = scmp.ne.s32.totalorder %s45_s18, %s1138_s21  ;;  %p1144_p2 = scmp.lt.s32.totalorder %s1138_s21, %s1138_s21 }
   0x7   :  { %p1145_p3 = por %p1144_p2, %p1143_p1 }
   0x9   :  { %p1146_p4 = pnand %p1145_p3, %p1139_p0 }
   0xb   :  { %1149 = shalt.err (!%p1146_p4)
}
   0xc   :  { %s1218_s22 = smov 128   ;;  %s1219_s23 = smov 8  }
   0xd   :  { %50 = dma.hbm_to_vmem [thread:$0]  %s1362_s5, 4096, %s45_s18, [#allocation6], %s1218_s22, %s1218_s22, %s1219_s23  }
   0xe   :  { %s1158_s26 = scalar_lea.vmem %s31_s20, 2048  ;;  %p1163_p6 = scmp.lt.s32.totalorder %s31_s20, %s31_s20 }
   0xf   :  { %p1159_p5 = scmp.ne.s32.totalorder %s31_s20, %s1158_s26  ;;  %p1164_p7 = scmp.lt.s32.totalorder %s1158_s26, %s1158_s26 }
  0x11   :  { %p1165_p8 = por %p1164_p7, %p1163_p6 }
  0x13   :  { %p1166_p9 = pnand %p1165_p8, %p1159_p5 }
  0x15   :  { %1169 = shalt.err (!%p1166_p9)
}
  0x16   :  { %36 = dma.hbm_to_vmem [thread:$0]  %s1360_s3, 2048, %s31_s20, [#allocation3], %s1218_s22, %s1218_s22, %s1219_s23  }
  0x17   :  { %s1220_s29 = smov [#allocation7]  }
  0x18   :  { %s58_s30 = sshll.u32 %s1220_s29, 4  ;;  %s59_s30 = int_to_ptr.vmem [resolvable:$true] %s58_s30 }
  0x19   :  { %s1178_s12 = scalar_lea.vmem %s59_s30, 2048  ;;  %p1183_p11 = scmp.lt.s32.totalorder %s59_s30, %s59_s30 }
  0x1a   :  { %p1179_p10 = scmp.ne.s32.totalorder %s59_s30, %s1178_s12  ;;  %p1184_p12 = scmp.lt.s32.totalorder %s1178_s12, %s1178_s12 }
  0x1c   :  { %p1185_p13 = por %p1184_p12, %p1183_p11 }
  0x1e   :  { %p1186_p0 = pnand %p1185_p13, %p1179_p10 }
  0x20   :  { %1189 = shalt.err (!%p1186_p0)
}
  0x21   :  { %s1221_s5 = smov 64   ;;  %s1222_s13 = smov 4  }
  0x22   :  { %64 = dma.hbm_to_vmem [thread:$0]  %s1364_s7, 2048, %s59_s30, [#allocation6], %s1221_s5, %s1221_s5, %s1222_s13  }
  0x23   :  { %1210 = dma.done.wait [#allocation3], 2048  }
  0x24   :  { %1211 = vsyncadd [#allocation3], 4294965248 }
  0x25   :  { %1212 = dma.done.wait [#allocation6], 6144  }
  0x26   :  { %1213 = vsyncadd [#allocation6], 4294961152  ;;  %v1223_v0 = vmov 0.0   ;;  %vm1224_vm0 = vmmov 0   ;;  %vm102_vm1 = vcmask 1045504   ;;  %v82_v2 = vld [vmem:[%s1357_s0] sm:$0xff] }
  0x27   :  { %984 = vmatprep.subr.bf16.mxu0 %v1223_v0  ;;  %986 = vmatprep.mubr.msk.bf16.mxu0 %vm1224_vm0, %v1223_v0  ;;  %v1021_v1 = vld [vmem:[%s1358_s1] sm:$0x3f]   ;;  %v83_v4 = vpack.c.bf16 %v82_v2, %v82_v2  ;;  %v1022_v5 = vld [vmem:[#allocation2 + $0x74] ss:$8 sps:$4 sm:$0xff]   ;;  %v1024_v6 = vld [vmem:[#allocation2 + $0x70] ss:$8 sps:$4 sm:$0xff]  }
  0x28   :  { %v104_v3 = vsel %vm102_vm1, %v1021_v1, 0  ;;  %vm98_vm2 = vcmask 97280   ;;  %v1025_v7 = vld [vmem:[#allocation2 + $0x64] ss:$8 sps:$4 sm:$0xff]   ;;  %259 = vmatprep.subr.bf16.mxu1 %v1022_v5  ;;  %v1027_v8 = vld [vmem:[#allocation2 + $0x60] ss:$8 sps:$4 sm:$0xff]  }
  0x29   :  { %985 = vmatpush3.bf16.msra.mxu0 %v104_v3  ;;  %260 = vmatpush1.bf16.msra.mxu1 %v1024_v6  ;;  %v1028_v9 = vld [vmem:[#allocation2 + $0x54] ss:$8 sps:$4 sm:$0xff]   ;;  %v1030_v10 = vld [vmem:[#allocation2 + $0x50] ss:$8 sps:$4 sm:$0xff]   ;;  %v1031_v11 = vld [vmem:[#allocation2 + $0x44] ss:$8 sps:$4 sm:$0xff]  }
  0x2a   :  { %261 = vmatprep.subr.bf16.mxu1 %v1025_v7  ;;  %v1033_v12 = vld [vmem:[#allocation2 + $0x40] ss:$8 sps:$4 sm:$0xff]   ;;  %v1034_v13 = vld [vmem:[#allocation2 + $0x34] ss:$8 sps:$4 sm:$0xff]   ;;  %v1036_v14 = vld [vmem:[#allocation2 + $0x30] ss:$8 sps:$4 sm:$0xff]  }
  0x2b   :  { %v1037_v15 = vld [vmem:[#allocation2 + $0x24] ss:$8 sps:$4 sm:$0xff]   ;;  %v1225_v16 = vmov 0   ;;  %v1039_v17 = vld [vmem:[#allocation2 + $0x20] ss:$8 sps:$4 sm:$0xff]   ;;  %v1094_v2 = vld [vmem:[#allocation7 + $0x78] sm:$0xff]  }
  0x2c   :  { %987 = vmatmul.mubr.msk.bf16.vlgmr.msra.gmra.mxu0 %vm98_vm2, %v83_v4  ;;  %291 = vmatprep.mubr.bf16.mxu1 %v1225_v16  ;;  %v1040_v18 = vld [vmem:[#allocation2 + $0x14] ss:$8 sps:$4 sm:$0xff]   ;;  %v1042_v19 = vld [vmem:[#allocation2 + $0x10] ss:$8 sps:$4 sm:$0xff]   ;;  %v1043_v20 = vld [vmem:[#allocation2 + $0x4] ss:$8 sps:$4 sm:$0xff]   ;;  %v169_v4 = vlaneseq }
  0x2d   :  { %262 = vmatpush1.bf16.msra.mxu1 %v1027_v8  ;;  %v1045_v21 = vld [vmem:[#allocation2] ss:$8 sps:$4 sm:$0xff]   ;;  %v1046_v22 = vld [vmem:[#allocation5 + $0x70] ss:$8 sps:$4 sm:$0xff]   ;;  %v1048_v23 = vld [vmem:[#allocation5 + $0x74] ss:$8 sps:$4 sm:$0xff]  }
  0x2e   :  { %263 = vmatprep.subr.bf16.mxu1 %v1028_v9  ;;  %v1051_v24 = vld [vmem:[#allocation5 + $0x64] ss:$8 sps:$4 sm:$0xff]   ;;  %514 = vmatprep.subr.bf16.mxu0 %v1048_v23  ;;  %v1049_v25 = vld [vmem:[#allocation5 + $0x60] ss:$8 sps:$4 sm:$0xff]   ;;  %v1054_v26 = vld [vmem:[#allocation5 + $0x54] ss:$8 sps:$4 sm:$0xff]  }
  0x2f   :  { %515 = vmatpush1.bf16.msra.mxu0 %v1046_v22  ;;  %v1052_v27 = vld [vmem:[#allocation5 + $0x50] ss:$8 sps:$4 sm:$0xff]   ;;  %v1057_v28 = vld [vmem:[#allocation5 + $0x44] ss:$8 sps:$4 sm:$0xff]   ;;  %v1055_v29 = vld [vmem:[#allocation5 + $0x40] ss:$8 sps:$4 sm:$0xff]  }
  0x30   :  { %516 = vmatprep.subr.bf16.mxu0 %v1051_v24  ;;  %v1060_v30 = vld [vmem:[#allocation5 + $0x34] ss:$8 sps:$4 sm:$0xff]   ;;  %v1058_v31 = vld [vmem:[#allocation5 + $0x30] ss:$8 sps:$4 sm:$0xff]   ;;  %v1063_v32 = vld [vmem:[#allocation5 + $0x24] ss:$8 sps:$4 sm:$0xff]  }
  0x31   :  { %264 = vmatpush1.bf16.msra.mxu1 %v1030_v10  ;;  %v1061_v33 = vld [vmem:[#allocation5 + $0x20] ss:$8 sps:$4 sm:$0xff]   ;;  %v1066_v34 = vld [vmem:[#allocation5 + $0x14] ss:$8 sps:$4 sm:$0xff]   ;;  %v1064_v35 = vld [vmem:[#allocation5 + $0x10] ss:$8 sps:$4 sm:$0xff]  }
  0x32   :  { %265 = vmatprep.subr.bf16.mxu1 %v1031_v11  ;;  %v1069_v36 = vld [vmem:[#allocation5 + $0x4] ss:$8 sps:$4 sm:$0xff]   ;;  %v1067_v37 = vld [vmem:[#allocation5] ss:$8 sps:$4 sm:$0xff]   ;;  %v1072_v38 = vld [vmem:[#allocation5 + $0xf4] ss:$8 sps:$4 sm:$0xff]  }
  0x33   :  { %517 = vmatpush1.bf16.msra.mxu0 %v1049_v25  ;;  %v1070_v39 = vld [vmem:[#allocation5 + $0xf0] ss:$8 sps:$4 sm:$0xff]   ;;  %v874_v40 = vld [vmem:[%s1359_s2] ss:$0 sm:$0xff]  ;;  %v1075_v51 = vld [vmem:[#allocation5 + $0xe4] ss:$8 sps:$4 sm:$0xff]  }
  0x34   :  { %518 = vmatprep.subr.bf16.mxu0 %v1054_v26  ;;  %v1073_v52 = vld [vmem:[#allocation5 + $0xe0] ss:$8 sps:$4 sm:$0xff]   ;;  %v1078_v53 = vld [vmem:[#allocation5 + $0xd4] ss:$8 sps:$4 sm:$0xff]   ;;  %v1076_v54 = vld [vmem:[#allocation5 + $0xd0] ss:$8 sps:$4 sm:$0xff]  }
  0x35   :  { %266 = vmatpush1.bf16.msra.mxu1 %v1033_v12  ;;  %v1081_v55 = vld [vmem:[#allocation5 + $0xc4] ss:$8 sps:$4 sm:$0xff]   ;;  %v1079_v56 = vld [vmem:[#allocation5 + $0xc0] ss:$8 sps:$4 sm:$0xff]   ;;  %v1084_v57 = vld [vmem:[#allocation5 + $0xb4] ss:$8 sps:$4 sm:$0xff]  }
  0x36   :  { %267 = vmatprep.subr.bf16.mxu1 %v1034_v13  ;;  %v1082_v58 = vld [vmem:[#allocation5 + $0xb0] ss:$8 sps:$4 sm:$0xff]   ;;  %v1087_v59 = vld [vmem:[#allocation5 + $0xa4] ss:$8 sps:$4 sm:$0xff]   ;;  %v1085_v60 = vld [vmem:[#allocation5 + $0xa0] ss:$8 sps:$4 sm:$0xff]  }
  0x37   :  { %519 = vmatpush1.bf16.msra.mxu0 %v1052_v27  ;;  %v1090_v61 = vld [vmem:[#allocation5 + $0x94] ss:$8 sps:$4 sm:$0xff]   ;;  %v1088_v62 = vld [vmem:[#allocation5 + $0x90] ss:$8 sps:$4 sm:$0xff]   ;;  %v1093_v63 = vld [vmem:[#allocation5 + $0x84] ss:$8 sps:$4 sm:$0xff]  }
  0x38   :  { %520 = vmatprep.subr.bf16.mxu0 %v1057_v28  ;;  %v1091_v1 = vld [vmem:[#allocation5 + $0x80] ss:$8 sps:$4 sm:$0xff]   ;;  %v1095_v3 = vld [vmem:[#allocation7 + $0x38] sm:$0xff]   ;;  %v170_v5 = vshrl.u32 %v169_v4, 7  ;;  %v1096_v27 = vld [vmem:[#allocation7 + $0x70] sm:$0xff]   ;;  %s1226_s17 = smov [#allocation8]  }
  0x39   :  { %268 = vmatpush1.bf16.msra.mxu1 %v1036_v14  ;;  %v167_v7 = vld [vmem:[%s1361_s4] sm:$0x3]  ;;  %v1097_v28 = vld [vmem:[#allocation7 + $0x30] sm:$0xff]   ;;  %s864_s18 = sshll.u32 %s1226_s17, 4  ;;  %vm856_vm3 = vcmask 64512   ;;  %s865_s18 = int_to_ptr.vmem [resolvable:$true] %s864_s18 }
  0x3a   :  { %269 = vmatprep.subr.bf16.mxu1 %v1037_v15  ;;  %v171_v6 = vsub.s32 0, %v170_v5  ;;  %v175_v8 = vsub.s32 1, %v170_v5  ;;  %v1117_v4 = vld [vmem:[%s1366_s9] sm:$0xff]   ;;  %p1195_p2 = scmp.lt.s32.totalorder %s865_s18, %s865_s18 }
  0x3b   :  { %521 = vmatpush1.bf16.msra.mxu0 %v1055_v29  ;;  %v1098_v29 = vld [vmem:[#allocation7 + $0x68] sm:$0xff]  }
  0x3c   :  { %522 = vmatprep.subr.bf16.mxu0 %v1060_v30  ;;  %v172_v9 = vrot.slane %v167_v7, %v171_v6  ;;  %v176_v10 = vrot.slane %v167_v7, %v175_v8  ;;  %v1099_v30 = vld [vmem:[#allocation7 + $0x28] sm:$0xff]  }
  0x3d   :  { %270 = vmatpush1.bf16.msra.mxu1 %v1039_v17 }
  0x3e   :  { %271 = vmatprep.subr.bf16.mxu1 %v1040_v18 }
  0x3f   :  { %523 = vmatpush1.bf16.msra.mxu0 %v1058_v31  ;;  %v1100_v31 = vld [vmem:[#allocation7 + $0x60] sm:$0xff]  }
  0x40   :  { %524 = vmatprep.subr.bf16.mxu0 %v1063_v32  ;;  %v1101_v32 = vld [vmem:[#allocation7 + $0x20] sm:$0xff]  }
  0x41   :  { %272 = vmatpush1.bf16.msra.mxu1 %v1042_v19 }
  0x42   :  { %273 = vmatprep.subr.bf16.mxu1 %v1043_v20 }
  0x43   :  { %525 = vmatpush1.bf16.msra.mxu0 %v1061_v33  ;;  %v1102_v33 = vld [vmem:[#allocation7 + $0x58] sm:$0xff]  }
  0x44   :  { %526 = vmatprep.subr.bf16.mxu0 %v1066_v34  ;;  %v1103_v34 = vld [vmem:[#allocation7 + $0x18] sm:$0xff]  }
  0x45   :  { %274 = vmatpush1.bf16.msra.mxu1 %v1045_v21 }
  0x46   :  { %953 = vmatprep.subr.bf16.mxu1 %v1094_v2  ;;  %v1115_v2 = vld [vmem:[%s1366_s9 + $0x10] sm:$0xff]  }
  0x47   :  { %527 = vmatpush1.bf16.msra.mxu0 %v1064_v35  ;;  %v1104_v35 = vld [vmem:[#allocation7 + $0x50] sm:$0xff]  }
  0x48   :  { %528 = vmatprep.subr.bf16.mxu0 %v1069_v36  ;;  %v1105_v36 = vld [vmem:[#allocation7 + $0x10] sm:$0xff]  }
  0x4b   :  { %529 = vmatpush1.bf16.msra.mxu0 %v1067_v37  ;;  %v1106_v37 = vld [vmem:[#allocation7 + $0x48] sm:$0xff]  }
  0x4c   :  { %530 = vmatprep.subr.bf16.mxu0 %v1072_v38  ;;  %v1107_v38 = vld [vmem:[#allocation7 + $0x8] sm:$0xff]  }
  0x4f   :  { %531 = vmatpush2.bf16.msra.mxu0 %v1070_v39  ;;  %v1108_v39 = vld [vmem:[#allocation7 + $0x40] sm:$0xff]  }
  0x50   :  { %532 = vmatprep.subr.bf16.mxu0 %v1075_v51 }
  0x53   :  { %533 = vmatpush2.bf16.msra.mxu0 %v1073_v52 }
  0x54   :  { %534 = vmatprep.subr.bf16.mxu0 %v1078_v53 }
  0x57   :  { %535 = vmatpush2.bf16.msra.mxu0 %v1076_v54 }
  0x58   :  { %536 = vmatprep.subr.bf16.mxu0 %v1081_v55 }
  0x5b   :  { %537 = vmatpush2.bf16.msra.mxu0 %v1079_v56 }
  0x5c   :  { %538 = vmatprep.subr.bf16.mxu0 %v1084_v57 }
  0x5f   :  { %539 = vmatpush2.bf16.msra.mxu0 %v1082_v58 }
  0x60   :  { %540 = vmatprep.subr.bf16.mxu0 %v1087_v59  ;;  %v1110_v59 = vld [vmem:[%s1366_s9 + $0x38] sm:$0xff]  }
  0x63   :  { %541 = vmatpush2.bf16.msra.mxu0 %v1085_v60 }
  0x64   :  { %542 = vmatprep.subr.bf16.mxu0 %v1090_v61  ;;  %v1111_v61 = vld [vmem:[%s1366_s9 + $0x30] sm:$0xff]  }
  0x67   :  { %543 = vmatpush2.bf16.msra.mxu0 %v1088_v62  ;;  %v1112_v62 = vld [vmem:[%s1366_s9 + $0x28] sm:$0xff]  }
  0x68   :  { %544 = vmatprep.subr.bf16.mxu0 %v1093_v63  ;;  %v1113_v63 = vld [vmem:[%s1366_s9 + $0x20] sm:$0xff]  }
  0x6b   :  { %545 = vmatpush2.bf16.msra.mxu0 %v1091_v1  ;;  %v1114_v1 = vld [vmem:[%s1366_s9 + $0x18] sm:$0xff]  }
  0xec   :  { %v140_v41 = vpop.f32.mrf.mxu0 }
  0xed   :  { %v141_v42 = vadd.f32 %v874_v40, %v140_v41  ;;  %v1109_v40 = vld [vmem:[#allocation7] sm:$0xff]  }
  0xee   :  { %v988_v43 = vpop.f32.mrf.mxu0  ;;  %v342_v41 = vld [vmem:[%s1363_s6] sm:$0x3] }
  0xef   :  { %v146_v44 = vpack.c.bf16 %v141_v42, %v141_v42  ;;  %v347_v42 = vrot.slane %v342_v41, %v171_v6  ;;  %v351_v43 = vrot.slane %v342_v41, %v175_v8  ;;  %v925_v6 = vld [vmem:[%s1365_s8] ss:$0 sm:$0xff]  ;;  %s1190_s8 = scalar_lea.vmem %s865_s18, 128 }
  0xf0   :  { %v143_v45 = vpop.f32.mrf.mxu0  ;;  %p1191_p1 = scmp.ne.s32.totalorder %s865_s18, %s1190_s8  ;;  %p1196_p3 = scmp.lt.s32.totalorder %s1190_s8, %s1190_s8 }
  0xf1   :  { %v147_v46 = vmul.bf16 1056980736, %v146_v44 }
  0xf2   :  { %v989_v47 = vpop.f32.mrf.mxu0  ;;  %p1197_p4 = por %p1196_p3, %p1195_p2 }
  0xf3   :  { %1118 = vtanh.bf16 %v147_v46 }
  0xf4   :  { %p1198_p5 = pnand %p1197_p4, %p1191_p1 }
 0x101   :  { %v1119_v48 = vpop.eup %1118 }
 0x102   :  { %v149_v49 = vmul.bf16 1056980736, %v1119_v48 }
 0x104   :  { %v150_v50 = vadd.bf16 1056980736, %v149_v49 }
 0x106   :  { %292 = vmatmul.mubr.bf16.vlgmr.msra.gmra.mxu1 %v150_v50 }
 0x107   :  { %954 = vmatpush3.bf16.msra.mxu1 %v1095_v3  ;;  %v1116_v3 = vld [vmem:[%s1366_s9 + $0x8] sm:$0xff]  }
 0x108   :  { %955 = vmatprep.subr.bf16.mxu1 %v1096_v27 }
 0x10b   :  { %956 = vmatpush3.bf16.msra.mxu1 %v1097_v28 }
 0x10c   :  { %957 = vmatprep.subr.bf16.mxu1 %v1098_v29 }
 0x10f   :  { %958 = vmatpush3.bf16.msra.mxu1 %v1099_v30 }
 0x110   :  { %959 = vmatprep.subr.bf16.mxu1 %v1100_v31 }
 0x113   :  { %960 = vmatpush3.bf16.msra.mxu1 %v1101_v32 }
 0x114   :  { %961 = vmatprep.subr.bf16.mxu1 %v1102_v33 }
 0x117   :  { %962 = vmatpush3.bf16.msra.mxu1 %v1103_v34 }
 0x118   :  { %963 = vmatprep.subr.bf16.mxu1 %v1104_v35 }
 0x11b   :  { %964 = vmatpush3.bf16.msra.mxu1 %v1105_v36 }
 0x11c   :  { %965 = vmatprep.subr.bf16.mxu1 %v1106_v37 }
 0x11f   :  { %966 = vmatpush3.bf16.msra.mxu1 %v1107_v38 }
 0x120   :  { %967 = vmatprep.subr.bf16.mxu1 %v1108_v39 }
 0x123   :  { %968 = vmatpush3.bf16.msra.mxu1 %v1109_v40 }
 0x124   :  { %990 = vmatprep.subr.bf16.mxu1 %v1223_v0 }
 0x1c6   :  { %v293_v11 = vpop.f32.mrf.mxu1 }
 0x1c7   :  { %v294_v12 = vadd.f32 %v293_v11, %v172_v9 }
 0x1c8   :  { %v295_v13 = vpop.f32.mrf.mxu1 }
 0x1c9   :  { %v300_v14 = vpack.c.bf16 %v294_v12, %v294_v12  ;;  %v296_v15 = vadd.f32 %v295_v13, %v176_v10 }
 0x1ca   :  { %v297_v16 = vpop.f32.mrf.mxu1 }
 0x1cb   :  { %v302_v17 = vmul.bf16 1056980736, %v300_v14  ;;  %v301_v18 = vpack.c.bf16 %v296_v15, %v296_v15  ;;  %v942_v16 = vld [vmem:[%s1367_s10] ss:$0 sm:$0xff] }
 0x1cc   :  { %v298_v19 = vpop.f32.mrf.mxu1 }
 0x1cd   :  { %1120 = vtanh.bf16 %v302_v17  ;;  %v303_v20 = vmul.bf16 1056980736, %v301_v18 }
 0x1cf   :  { %1122 = vtanh.bf16 %v303_v20 }
 0x1db   :  { %v1121_v21 = vpop.eup %1120 }
 0x1dc   :  { %v306_v23 = vmul.bf16 1056980736, %v1121_v21 }
 0x1dd   :  { %v1123_v22 = vpop.eup %1122 }
 0x1de   :  { %v307_v24 = vmul.bf16 1056980736, %v1123_v22  ;;  %v308_v26 = vadd.bf16 1056980736, %v306_v23 }
 0x1e0   :  { %v309_v25 = vadd.bf16 1056980736, %v307_v24 }
 0x1e2   :  { %546 = vmatprep.mubr.bf16.mxu0 %v309_v25 }
 0x1e3   :  { %547 = vmatmul.mubr.bf16.vlgmr.msra.gmra.mxu0 %v308_v26 }
 0x2a3   :  { %v548_v44 = vpop.f32.mrf.mxu0 }
 0x2a4   :  { %v549_v45 = vadd.f32 %v548_v44, %v347_v42 }
 0x2a5   :  { %v550_v46 = vpop.f32.mrf.mxu0 }
 0x2a6   :  { %v555_v47 = vpack.c.bf16 %v549_v45, %v549_v45  ;;  %v551_v48 = vadd.f32 %v550_v46, %v351_v43 }
 0x2a7   :  { %v552_v49 = vpop.f32.mrf.mxu0 }
 0x2a8   :  { %v557_v50 = vmul.bf16 1056980736, %v555_v47  ;;  %v556_v51 = vpack.c.bf16 %v551_v48, %v551_v48 }
 0x2a9   :  { %v553_v52 = vpop.f32.mrf.mxu0 }
 0x2aa   :  { %1124 = vtanh.bf16 %v557_v50  ;;  %v558_v53 = vmul.bf16 1056980736, %v556_v51 }
 0x2ac   :  { %1126 = vtanh.bf16 %v558_v53 }
 0x2b8   :  { %v1125_v54 = vpop.eup %1124 }
 0x2b9   :  { %v561_v56 = vmul.bf16 1056980736, %v1125_v54 }
 0x2ba   :  { %v1127_v55 = vpop.eup %1126 }
 0x2bb   :  { %v562_v57 = vmul.bf16 1056980736, %v1127_v55  ;;  %v563_v60 = vadd.bf16 1056980736, %v561_v56 }
 0x2bd   :  { %v564_v58 = vadd.bf16 1056980736, %v562_v57 }
 0x2bf   :  { %732 = vmatprep.mubr.bf16.mxu1 %v564_v58 }
 0x2c0   :  { %733 = vmatmul.mubr.bf16.vlgmr.msra.gmra.mxu1 %v563_v60 }
 0x2c1   :  { %991 = vmatpush3.bf16.msra.mxu1 %v1110_v59  ;;  %1006 = vmatprep.mubr.msk.bf16.mxu1 %vm1224_vm0, %v1223_v0 }
 0x2c2   :  { %992 = vmatprep.subr.bf16.mxu1 %v1223_v0 }
 0x2c5   :  { %993 = vmatpush3.bf16.msra.mxu1 %v1111_v61 }
 0x2c6   :  { %994 = vmatprep.subr.bf16.mxu1 %v1223_v0 }
 0x2c9   :  { %995 = vmatpush3.bf16.msra.mxu1 %v1112_v62 }
 0x2ca   :  { %996 = vmatprep.subr.bf16.mxu1 %v1223_v0 }
 0x2cd   :  { %997 = vmatpush3.bf16.msra.mxu1 %v1113_v63 }
 0x2ce   :  { %998 = vmatprep.subr.bf16.mxu1 %v1223_v0 }
 0x2d1   :  { %999 = vmatpush3.bf16.msra.mxu1 %v1114_v1 }
 0x2d2   :  { %1000 = vmatprep.subr.bf16.mxu1 %v1223_v0 }
 0x2d5   :  { %1001 = vmatpush3.bf16.msra.mxu1 %v1115_v2 }
 0x2d6   :  { %1002 = vmatprep.subr.bf16.mxu1 %v1223_v0 }
 0x2d9   :  { %1003 = vmatpush3.bf16.msra.mxu1 %v1116_v3 }
 0x2da   :  { %1004 = vmatprep.subr.bf16.mxu1 %v1223_v0 }
 0x2dd   :  { %1005 = vmatpush3.bf16.msra.mxu1 %v1117_v4 }
 0x380   :  { %v969_v5 = vpop.f32.mrf.mxu1 }
 0x382   :  { %v970_v7 = vpop.f32.mrf.mxu1 }
 0x383   :  { %v971_v8 = vadd.f32 %v970_v7, %v969_v5 }
 0x384   :  { %v972_v9 = vpop.f32.mrf.mxu1 }
 0x385   :  { %v735_v10 = vadd.f32 %v971_v8, %v925_v6 }
 0x386   :  { %v973_v11 = vpop.f32.mrf.mxu1 }
 0x387   :  { %v740_v12 = vpack.c.bf16 %v735_v10, %v735_v10 }
 0x389   :  { %v741_v13 = vmul.bf16 1056980736, %v740_v12 }
 0x38b   :  { %1128 = vtanh.bf16 %v741_v13 }
 0x399   :  { %v1129_v14 = vpop.eup %1128 }
 0x39a   :  { %v743_v0 = vmul.bf16 1056980736, %v1129_v14 }
 0x39c   :  { %v744_v15 = vadd.bf16 1056980736, %v743_v0 }
 0x39e   :  { %1007 = vmatmul.mubr.bf16.vlgmr.msra.gmra.mxu1 %v744_v15 }
 0x45e   :  { %v850_v17 = vpop.f32.mrf.mxu1 }
 0x45f   :  { %v851_v18 = vadd.f32 %v942_v16, %v850_v17 }
 0x460   :  { %v1008_v19 = vpop.f32.mrf.mxu1 }
 0x461   :  { %857 = vst.msk [vmem:[#allocation8] sm:$0xff] %vm856_vm3, %v851_v18 }
 0x462   :  { %v853_v20 = vpop.f32.mrf.mxu1 }
 0x463   :  { %1201 = shalt.err (!%p1198_p5)
}
 0x464   :  { %867 = dma.vmem_to_hbm [thread:$0]  %s865_s18, 128, %s1368_s11, [#allocation4]   ;;  %v1009_v21 = vpop.f32.mrf.mxu1 }
 0x465   :  { %1214 = dma.done.wait [#allocation4], 128  }
 0x466   :  { %1215 = vsyncadd [#allocation4], 4294967168 }
 0x467   :  { %871 = vsyncpa [#allocation3], 1 }
 0x468   :  { %872 = vsyncpa [#allocation6], 1 }
 0x469   :  { %873 = vsyncpa [#allocation4], 1 }

</bundles_post_ra>
